<compile_context>
chip_gen: v5e
topology: v5e:2x2
jax: 0.10.0
libtpu: 0.0.40
codegen_flags: <defaults>
</compile_context>

<pallas_src>
import functools

import jax
import jax.numpy as jnp
from jax.experimental import pallas as pl
from jax.experimental.pallas import tpu as pltpu


def _round_up(n, m):
    return ((n + m - 1) // m) * m


def _linear_kernel(x_ref, w_ref, b_ref, o_ref):
    # x_ref: (TM, K_fold)     streamed per grid step
    # w_ref: (K_fold, N_fold) VMEM-resident (constant index_map)
    # b_ref: (1, N_fold)      VMEM-resident
    # o_ref: (TM, N_fold)     streamed, lane-dense (unmasked 128-lane stores)
    acc = jnp.dot(x_ref[...], w_ref[...], preferred_element_type=jnp.float32)
    o_ref[...] = (acc + b_ref[...]).astype(o_ref.dtype)


def _linear_add_kernel(x_ref, w_ref, b_ref, a_ref, o_ref):
    # Same as _linear_kernel plus a fused elementwise add of another embedding slab.
    acc = jnp.dot(x_ref[...], w_ref[...], preferred_element_type=jnp.float32)
    acc = acc + b_ref[...] + a_ref[...].astype(jnp.float32)
    o_ref[...] = acc.astype(o_ref.dtype)


def fold_params(weight, bias, dtype=jnp.float32):
    """Precompute blockdiag(W^T, F) and the tiled bias once (weights are static)."""
    d_model, d_inp = weight.shape
    # Minimum fold that makes the output 128 lanes (do not raise it further - v5e).
    F = 128 // d_model if (d_model <= 128 and 128 % d_model == 0) else 1
    wt = weight.T.astype(dtype)                                # (d_inp, d_model)
    w_bd = jnp.kron(jnp.eye(F, dtype=dtype), wt)               # (F*d_inp, F*d_model)
    b_fold = jnp.tile(bias.astype(dtype), (F,)).reshape(1, F * d_model)
    return F, w_bd, b_fold


def time_feature_embedding(x, w_bd, b_fold, *, fold, d_model,
                           add_to=None, out_dtype=None,
                           tile_fold_rows=8192, vmem_cap_bytes=48 * 1024 * 1024):
    """x: (B, L, d_inp); w_bd/b_fold from fold_params() -> (B, L, d_model)."""
    B, L, d_inp = x.shape
    M = B * L
    out_dtype = x.dtype if out_dtype is None else out_dtype

    # Lane-dense fold only when the folded row count is exact (no pad, no trim).
    F = fold if (M % fold == 0) else 1
    if F == fold:
        w, b = w_bd, b_fold
    else:
        # Fallback keeps correctness with masked d_model-lane stores (loses the
        # unmasked-128-lane-store benefit, but avoids any extra HBM pass).
        w, b = w_bd[:d_inp, :d_model], b_fold[:, :d_model]
    K_fold, N_fold = d_inp * F, d_model * F

    M_fold = M // F
    x_fold = x.reshape(M_fold, K_fold)                  # contiguous: metadata-only
    add_fold = None if add_to is None else add_to.reshape(M_fold, N_fold)

    # ---- Tile sizing (corrected accounting: x tile lane-pads to 128 lanes) ----
    itemsize = jnp.dtype(x.dtype).itemsize
    align = 32 // itemsize                              # sublanes: f32 -> 8, bf16 -> 16
    if M_fold < align:
        tm = M_fold                                     # block == full array dim (allowed)
    else:
        tm = min(tile_fold_rows, (M_fold // align) * align)
        # v7x megacore: keep >= 2 grid steps when M is big enough to split.
        if pl.cdiv(M_fold, tm) < 2 and M_fold >= 2 * align:
            tm = _round_up(pl.cdiv(M_fold, 2), align)
    grid = (pl.cdiv(M_fold, tm),)

    def lane(n):
        return _round_up(n, 128)

    out_itemsize = jnp.dtype(out_dtype).itemsize
    step_bytes = tm * lane(K_fold) * itemsize + tm * lane(N_fold) * out_itemsize
    if add_fold is not None:
        step_bytes += tm * lane(N_fold) * jnp.dtype(add_fold.dtype).itemsize
    resident_bytes = lane(N_fold) * (_round_up(K_fold, align) + align) * itemsize
    vmem_bytes = 2 * step_bytes + 2 * resident_bytes + (2 << 20)   # dbl-buffered + slack
    vmem_bytes = int(min(max(vmem_bytes, 32 * 1024 * 1024), vmem_cap_bytes))

    x_spec = pl.BlockSpec((tm, K_fold), lambda i: (i, 0))          # streamed
    w_spec = pl.BlockSpec((K_fold, N_fold), lambda i: (0, 0))      # resident
    b_spec = pl.BlockSpec((1, N_fold), lambda i: (0, 0))           # resident
    o_spec = pl.BlockSpec((tm, N_fold), lambda i: (i, 0))          # streamed

    if add_fold is None:
        kernel = _linear_kernel
        in_specs = [x_spec, w_spec, b_spec]
        operands = (x_fold, w, b)
    else:
        kernel = _linear_add_kernel
        in_specs = [x_spec, w_spec, b_spec, o_spec]
        operands = (x_fold, w, b, add_fold)

    out_fold = pl.pallas_call(
        kernel,
        out_shape=jax.ShapeDtypeStruct((M_fold, N_fold), out_dtype),
        grid_spec=pltpu.PrefetchScalarGridSpec(
            num_scalar_prefetch=0,
            grid=grid,
            in_specs=in_specs,
            out_specs=o_spec,
        ),
        compiler_params=pltpu.CompilerParams(
            dimension_semantics=("parallel",),          # v7x: shard steps over 2 TCs
            vmem_limit_bytes=vmem_bytes,
        ),
    )(*operands)

    return out_fold.reshape(B, L, d_model)              # metadata-only reshape, no trim


if __name__ == "__main__":
    # Module config: freq='h' -> d_inp = 4; pick small d_model = 32.
    d_inp, d_model = 4, 32
    B, L = 2, 16

    key = jax.random.PRNGKey(0)
    kx, kw, kb, ka = jax.random.split(key, 4)

    # Deterministic synthetic params (shapes follow nn.Linear(d_inp, d_model)).
    weight = jax.random.normal(kw, (d_model, d_inp), dtype=jnp.float32) * 0.1
    bias = jax.random.normal(kb, (d_model,), dtype=jnp.float32) * 0.1
    x = jax.random.normal(kx, (B, L, d_inp), dtype=jnp.float32)

    # Fold the params once (weights are static per call) and jit the wrapper so the
    # reshape / kernel dispatch stays fused.
    F, w_bd, b_fold = fold_params(weight, bias, x.dtype)
    fwd = jax.jit(functools.partial(time_feature_embedding, fold=F, d_model=d_model))

    # Base path (lane-dense fold, no pad / no trim).
    out = jax.block_until_ready(fwd(x, w_bd, b_fold))
    ref = x @ weight.T + bias
    assert out.shape == (B, L, d_model)
    assert jnp.allclose(out, ref, atol=1e-5, rtol=1e-5)

    # Fused downstream add (DataEmbedding sums this with value + positional embeds).
    other = jax.random.normal(ka, (B, L, d_model), dtype=jnp.float32)
    out_add = jax.block_until_ready(fwd(x, w_bd, b_fold, add_to=other))
    assert jnp.allclose(out_add, ref + other, atol=1e-5, rtol=1e-5)

    # Ragged M (M % F != 0): pad/trim-free fallback with a masked partial last tile.
    B2, L2 = 3, 7
    x2 = jax.random.normal(kx, (B2, L2, d_inp), dtype=jnp.float32)
    out2 = jax.block_until_ready(fwd(x2, w_bd, b_fold))
    assert jnp.allclose(out2, x2 @ weight.T + bias, atol=1e-5, rtol=1e-5)

    print("KERNEL_OK")
</pallas_src>

<mosaic_0001>
module attributes {stable_mosaic.version = 11 : i64} {
  func.func @_linear_kernel(%arg0: i32, %arg1: memref<8x16xf32, #tpu.memory_space<vmem>>, %arg2: memref<16x128xf32, #tpu.memory_space<vmem>>, %arg3: memref<1x128xf32, #tpu.memory_space<vmem>>, %arg4: memref<8x128xf32, #tpu.memory_space<vmem>>) attributes {dimension_semantics = [#tpu.dimension_semantics<parallel>], iteration_bounds = array<i64: 1>, scalar_prefetch = 0 : i64, scratch_operands = 0 : i64, tpu.core_type = #tpu.core_type<tc>, window_params = [{transform_indices = @transform_0, window_bounds = array<i64: 8, 16>}, {pipeline_mode = #tpu.pipeline_mode<synchronous>, transform_indices = @transform_1, window_bounds = array<i64: 16, 128>}, {pipeline_mode = #tpu.pipeline_mode<synchronous>, transform_indices = @transform_2, window_bounds = array<i64: 1, 128>}, {transform_indices = @transform_3, window_bounds = array<i64: 8, 128>}]} {
    %c0 = arith.constant 0 : index
    %c0_0 = arith.constant 0 : index
    %0 = vector.load %arg1[%c0, %c0_0] : memref<8x16xf32, #tpu.memory_space<vmem>>, vector<8x16xf32>
    %c0_1 = arith.constant 0 : index
    %c0_2 = arith.constant 0 : index
    %1 = vector.load %arg2[%c0_1, %c0_2] : memref<16x128xf32, #tpu.memory_space<vmem>>, vector<16x128xf32>
    %cst = arith.constant dense<0.000000e+00> : vector<8x128xf32>
    %2 = tpu.matmul %0, %1, %cst {dimension_numbers = #tpu.dot_dimension_numbers<[1], [0], [0], [1], [0, 0, 1, 1], [], []>} : vector<8x16xf32>, vector<16x128xf32>, vector<8x128xf32> -> vector<8x128xf32>
    %c0_3 = arith.constant 0 : index
    %c0_4 = arith.constant 0 : index
    %3 = vector.load %arg3[%c0_3, %c0_4] : memref<1x128xf32, #tpu.memory_space<vmem>>, vector<1x128xf32>
    %4 = vector.broadcast %3 : vector<1x128xf32> to vector<8x128xf32>
    %5 = arith.addf %2, %4 : vector<8x128xf32>
    %c0_5 = arith.constant 0 : index
    %c0_6 = arith.constant 0 : index
    %6 = vector.load %arg4[%c0_5, %c0_6] : memref<8x128xf32, #tpu.memory_space<vmem>>, vector<8x128xf32>
    tpu.vector_store %arg4[%c0_5, %c0_6], %5 {strides = array<i32>} : memref<8x128xf32, #tpu.memory_space<vmem>>, vector<8x128xf32>,
    return
  }
  func.func @transform_0(%arg0: i32) -> (i32, i32) {
    %c0_i32 = arith.constant 0 : i32
    %c0_i32_0 = arith.constant 0 : i32
    return %arg0, %c0_i32 : i32, i32
  }
  func.func @transform_1(%arg0: i32) -> (i32, i32) {
    %c0_i32 = arith.constant 0 : i32
    %c0_i32_0 = arith.constant 0 : i32
    %c0_i32_1 = arith.constant 0 : i32
    return %c0_i32, %c0_i32_0 : i32, i32
  }
  func.func @transform_2(%arg0: i32) -> (i32, i32) {
    %c0_i32 = arith.constant 0 : i32
    %c0_i32_0 = arith.constant 0 : i32
    %c0_i32_1 = arith.constant 0 : i32
    return %c0_i32, %c0_i32_0 : i32, i32
  }
  func.func @transform_3(%arg0: i32) -> (i32, i32) {
    %c0_i32 = arith.constant 0 : i32
    %c0_i32_0 = arith.constant 0 : i32
    return %arg0, %c0_i32 : i32, i32
  }
}

</mosaic_0001>

<bundles_post_ra>
// kernel: time_feature_embedding.1
= control target key start
LH: loop header
LB: loop body
LE: loop exit
PB: predicated region body
PF: predicated region fallthrough
CT: control target
= control target key end

     0   :  { %vm21_vm0 = vcmask 130048   ;;  %s87_s1 = inlined_call_operand.vmem [shape: f32[16,128], index: 1, kind: input, shape index: {}]   ;;  %s88_s0 = inlined_call_operand.vmem [shape: f32[8,16], index: 0, kind: input, shape index: {}]   ;;  %s89_s2 = inlined_call_operand.vmem [shape: f32[1,128], index: 2, kind: input, shape index: {}]   ;;  %s90_s3 = inlined_call_operand.vmem [shape: f32[8,128], index: 3, kind: output, shape index: {}]  }
   0x1   :  { %v16_v0 = vld [vmem:[%s87_s1 + $0x8] sm:$0xff]  ;;  %v15_v1 = vld [vmem:[%s87_s1] sm:$0xff] }
   0x2   :  { %39 = vmatpush.msra.mxu0 %v16_v0  ;;  %v14_v2 = vld [vmem:[%s88_s0] sm:$0xff] }
   0x3   :  { %v51_v3 = vld [vmem:[%s89_s2] ss:$0 sm:$0xff] }
   0x4   :  { %40 = vmatpush.msra.mxu0 %v15_v1 }
   0x5   :  { %50 = vmatmul.msk.f32.vlgmr.msra.gmra.mxu0 %vm21_vm0, %v14_v2 }
  0x82   :  { %v42_v4 = vpop.f32.mrf.mxu0 }
  0x83   :  { %v43_v5 = vadd.f32 %v51_v3, %v42_v4 }
  0x85   :  { %45 = vst [vmem:[%s90_s3] sm:$0xff] %v43_v5 }

</bundles_post_ra>
